<compile_context>
chip_gen: v7x
topology: tpu7x:2x2x1
jax: 0.10.0
libtpu: 0.0.40
codegen_flags: <defaults>
</compile_context>

<pallas_src>
import functools

import jax
import jax.numpy as jnp
from jax.experimental import pallas as pl
from jax.experimental.pallas import tpu as pltpu

_MIB = 1024 * 1024


# --------------------------------------------------------------------------- #
# helpers
# --------------------------------------------------------------------------- #
def _round_up(n, m):
    return ((n + m - 1) // m) * m


def _largest_divisor_leq(n, cap):
    cap = max(1, min(n, cap))
    for d in range(cap, 0, -1):
        if n % d == 0:
            return d
    return 1


def _neg_limit(dtype):
    if jnp.issubdtype(dtype, jnp.floating):
        return jnp.finfo(dtype).min
    return jnp.iinfo(dtype).min


def _mlp_gate(avg, mx, w1t, w2t):
    """Shared MLP on both pooled vectors; returns the sigmoid gate in f32.

    fc(avg) + fc(max) = (relu(avg@W1t) + relu(max@W1t)) @ W2t  (no biases).
    """
    h_avg = jnp.maximum(jnp.dot(avg, w1t, preferred_element_type=jnp.float32), 0.0)
    h_max = jnp.maximum(jnp.dot(mx, w1t, preferred_element_type=jnp.float32), 0.0)
    logits = jnp.dot(h_avg + h_max, w2t, preferred_element_type=jnp.float32)
    return 1.0 / (1.0 + jnp.exp(-logits))          # sigmoid (exp runs on the EUP)


# --------------------------------------------------------------------------- #
# fused single-pass kernel (whole (C, L) slab per batch tile resident in VMEM)
# --------------------------------------------------------------------------- #
def _fused_kernel(x_ref, w1t_ref, w2t_ref, o_ref):
    # x_ref:   (TB, C, L)   native dtype, full C / L extents (no padding)
    # w1t_ref: (C, H) f32   Linear(C, H).weight, pre-transposed
    # w2t_ref: (H, C) f32   Linear(H, C).weight, pre-transposed
    x = x_ref[...]
    inv_l = 1.0 / x.shape[-1]

    avg = jnp.sum(x, axis=-1, dtype=jnp.float32) * inv_l      # (TB, C) f32
    mx = jnp.max(x, axis=-1).astype(jnp.float32)              # (TB, C) f32

    gate = _mlp_gate(avg, mx, w1t_ref[...], w2t_ref[...])     # (TB, C) f32

    # Gating multiply in the input dtype (no f32 copy of the big tensor).
    o_ref[...] = (gate.astype(x.dtype)[:, :, None] * x).astype(o_ref.dtype)


def _fused_call(x, w1t, w2t, per_batch_bytes, wbytes, max_block_bytes):
    b, c, l = x.shape
    hdim = w1t.shape[1]

    # Batch tile: amortize per-step overhead but keep >= min(b, 4) grid steps
    # so v7x's two TensorCores each see >= 2 steps (double-buffered pipeline).
    tb_cap = max(1, min(128, max_block_bytes // per_batch_bytes, b))
    tb_cap = min(tb_cap, max(1, b // min(b, 4)))
    tb = _largest_divisor_leq(b, tb_cap)     # divides b: no padding, no remainder
    grid_b = b // tb

    block_bytes = tb * per_batch_bytes
    # 2x double-buffered input block + 2x output block + weights + headroom.
    vmem_limit = max(32 * _MIB, 4 * block_bytes + 4 * wbytes + 8 * _MIB)

    return pl.pallas_call(
        _fused_kernel,
        out_shape=jax.ShapeDtypeStruct((b, c, l), x.dtype),
        grid_spec=pltpu.PrefetchScalarGridSpec(
            num_scalar_prefetch=0,
            grid=(grid_b,),
            in_specs=[
                pl.BlockSpec((tb, c, l), lambda i: (i, 0, 0)),
                pl.BlockSpec((c, hdim), lambda i: (0, 0)),
                pl.BlockSpec((hdim, c), lambda i: (0, 0)),
            ],
            out_specs=pl.BlockSpec((tb, c, l), lambda i: (i, 0, 0)),
        ),
        compiler_params=pltpu.CompilerParams(
            dimension_semantics=("parallel",),
            vmem_limit_bytes=int(vmem_limit),
        ),
    )(x, w1t, w2t)


# --------------------------------------------------------------------------- #
# fallback for large C*L: two-pass, L tiled
# --------------------------------------------------------------------------- #
def _gate_kernel(x_ref, w1t_ref, w2t_ref, gate_ref, sum_acc, max_acc, *, true_l, tl):
    # Grid: (batch, L-tiles); L axis is "arbitrary" (reduction).
    j = pl.program_id(1)
    x = x_ref[...]                                           # (1, C, TL)

    if true_l % tl != 0:
        # Mask only matters on the partial tail tile; branchless global-lane mask.
        lane = jax.lax.broadcasted_iota(jnp.int32, (1, 1, x.shape[-1]), 2) + j * tl
        valid = lane < true_l
        x_sum = jnp.where(valid, x, jnp.asarray(0, dtype=x.dtype))
        x_max = jnp.where(valid, x, jnp.asarray(_neg_limit(x.dtype), dtype=x.dtype))
    else:
        x_sum = x
        x_max = x

    part_sum = jnp.sum(x_sum, axis=-1, dtype=jnp.float32)    # (1, C)
    part_max = jnp.max(x_max, axis=-1).astype(jnp.float32)   # (1, C)

    @pl.when(j == 0)
    def _():
        sum_acc[...] = part_sum
        max_acc[...] = part_max

    @pl.when(j > 0)
    def _():
        sum_acc[...] = sum_acc[...] + part_sum
        max_acc[...] = jnp.maximum(max_acc[...], part_max)

    @pl.when(j == pl.num_programs(1) - 1)
    def _():
        avg = sum_acc[...] * (1.0 / true_l)
        gate = _mlp_gate(avg, max_acc[...], w1t_ref[...], w2t_ref[...])
        gate_ref[...] = gate[:, :, None]                      # (1, C, 1) f32


def _apply_gate_kernel(gate_ref, x_ref, o_ref):
    x = x_ref[...]                                           # (1, C, TL)
    g = gate_ref[...].astype(x.dtype)                        # (1, C, 1)
    o_ref[...] = (g * x).astype(o_ref.dtype)


def _pick_l_tile(l, c_phys, itemsize, max_block_bytes):
    tl = max(128, (max_block_bytes // (c_phys * itemsize)) // 128 * 128)
    if tl >= l:
        return l, 1                     # full extent: always a legal block dim
    return tl, pl.cdiv(l, tl)


def _two_pass_call(x, w1t, w2t, wbytes, max_block_bytes):
    b, c, l = x.shape
    hdim = w1t.shape[1]
    itemsize = jnp.dtype(x.dtype).itemsize
    c_phys = _round_up(c, 8)

    # ---- pass 1: pooled stats over L tiles -> gate (B, C, 1) f32 ----------
    tl, grid_l = _pick_l_tile(l, c_phys, itemsize, max_block_bytes)
    blk1 = c_phys * _round_up(tl, 128) * itemsize
    vmem1 = max(32 * _MIB, 2 * blk1 + 4 * wbytes + 8 * _MIB)

    gate = pl.pallas_call(
        functools.partial(_gate_kernel, true_l=l, tl=tl),
        out_shape=jax.ShapeDtypeStruct((b, c, 1), jnp.float32),
        grid_spec=pltpu.PrefetchScalarGridSpec(
            num_scalar_prefetch=0,
            grid=(b, grid_l),
            in_specs=[
                pl.BlockSpec((1, c, tl), lambda i, j: (i, 0, j)),
                pl.BlockSpec((c, hdim), lambda i, j: (0, 0)),
                pl.BlockSpec((hdim, c), lambda i, j: (0, 0)),
            ],
            out_specs=pl.BlockSpec((1, c, 1), lambda i, j: (i, 0, 0)),
            scratch_shapes=[
                pltpu.VMEM((1, c), jnp.float32),   # running sum
                pltpu.VMEM((1, c), jnp.float32),   # running max
            ],
        ),
        compiler_params=pltpu.CompilerParams(
            dimension_semantics=("parallel", "arbitrary"),
            vmem_limit_bytes=int(vmem1),
        ),
    )(x, w1t, w2t)

    # ---- pass 2: out = gate * x, lane-dense L tiles ------------------------
    tl2, grid_l2 = _pick_l_tile(l, c_phys, itemsize, max_block_bytes)
    blk2 = c_phys * _round_up(tl2, 128) * itemsize
    vmem2 = max(32 * _MIB, 4 * blk2 + 8 * _MIB)

    return pl.pallas_call(
        _apply_gate_kernel,
        out_shape=jax.ShapeDtypeStruct((b, c, l), x.dtype),
        grid_spec=pltpu.PrefetchScalarGridSpec(
            num_scalar_prefetch=0,
            grid=(b, grid_l2),
            in_specs=[
                pl.BlockSpec((1, c, 1), lambda i, j: (i, 0, 0)),
                pl.BlockSpec((1, c, tl2), lambda i, j: (i, 0, j)),
            ],
            out_specs=pl.BlockSpec((1, c, tl2), lambda i, j: (i, 0, j)),
        ),
        compiler_params=pltpu.CompilerParams(
            dimension_semantics=("parallel", "parallel"),
            vmem_limit_bytes=int(vmem2),
        ),
    )(gate, x)


# --------------------------------------------------------------------------- #
# public wrapper
# --------------------------------------------------------------------------- #
def channel_attention(x, w1, w2, *,
                      max_block_bytes=8 * _MIB,
                      fused_block_limit_bytes=12 * _MIB):
    """ChannelAttention forward.

    x:  (B, C, L)
    w1: (H, C)  = nn.Linear(C, H, bias=False).weight
    w2: (C, H)  = nn.Linear(H, C, bias=False).weight

    On v6e/v5e (128 MiB VMEM) it is fine to raise max_block_bytes (e.g. 16 MiB)
    for slightly larger blocks; the defaults are sized for v7x's 64 MiB VMEM.
    """
    b, c, l = x.shape
    hdim = w1.shape[0]
    assert w1.shape == (hdim, c) and w2.shape == (c, hdim)

    # Pre-transpose + cast FC weights once (no per-step transpose / upconvert).
    w1t = w1.T.astype(jnp.float32)                   # (C, H)
    w2t = w2.T.astype(jnp.float32)                   # (H, C)
    wbytes = 4 * (w1t.size + w2t.size)

    itemsize = jnp.dtype(x.dtype).itemsize
    # Physical (tile-padded) VMEM footprint of one batch element's (C, L) slab.
    per_batch_bytes = _round_up(c, 8) * _round_up(l, 128) * itemsize

    if per_batch_bytes <= max(max_block_bytes, fused_block_limit_bytes):
        return _fused_call(x, w1t, w2t, per_batch_bytes, wbytes, max_block_bytes)
    # Large C*L: whole slab does not fit a VMEM block -> L-tiled two-pass path.
    return _two_pass_call(x, w1t, w2t, wbytes, max_block_bytes)


def channel_attention_ref(x, w1, w2):
    """Pure-JAX reference matching the PyTorch forward."""
    avg = jnp.mean(x, axis=-1)                       # (B, C)
    mx = jnp.max(x, axis=-1)                         # (B, C)

    def fc(v):
        return jnp.maximum(v @ w1.T, 0.0) @ w2.T

    gate = jax.nn.sigmoid(fc(avg) + fc(mx))          # (B, C)
    return gate[:, :, None] * x


if __name__ == "__main__":
    # Small shapes consistent with the module: (b, c, l), ratio=1.
    B, C, L = 2, 4, 16
    ratio = 1
    H = C // ratio

    key = jax.random.PRNGKey(0)
    kx, kw1, kw2 = jax.random.split(key, 3)

    x = jax.random.normal(kx, (B, C, L), dtype=jnp.float32)
    # Deterministic synthetic weights; no checkpoint loading.
    w1 = jax.random.normal(kw1, (H, C), dtype=jnp.float32) * 0.1
    w2 = jax.random.normal(kw2, (C, H), dtype=jnp.float32) * 0.1

    # --- fused single-pass path -------------------------------------------
    ref = channel_attention_ref(x, w1, w2)
    out = jax.block_until_ready(channel_attention(x, w1, w2))
    assert out.shape == (B, C, L)
    assert jnp.allclose(out, ref, atol=1e-5, rtol=1e-5), "fused path mismatch"

    # --- force the L-tiled two-pass fallback (with an unaligned L tail) -----
    B2, C2, L2 = 3, 4, 200
    x2 = jax.random.normal(kx, (B2, C2, L2), dtype=jnp.float32)
    ref2 = channel_attention_ref(x2, w1, w2)
    out2 = jax.block_until_ready(
        channel_attention(x2, w1, w2, max_block_bytes=4096,
                          fused_block_limit_bytes=0))
    assert out2.shape == (B2, C2, L2)
    assert jnp.allclose(out2, ref2, atol=1e-5, rtol=1e-5), "fallback path mismatch"

    print("KERNEL_OK")
</pallas_src>

<mosaic_0001>
module attributes {stable_mosaic.version = 11 : i64} {
  func.func @_fused_kernel(%arg0: i32, %arg1: memref<1x4x16xf32, #tpu.memory_space<vmem>>, %arg2: memref<4x4xf32, #tpu.memory_space<vmem>>, %arg3: memref<4x4xf32, #tpu.memory_space<vmem>>, %arg4: memref<1x4x16xf32, #tpu.memory_space<vmem>>) attributes {dimension_semantics = [#tpu.dimension_semantics<parallel>], iteration_bounds = array<i64: 2>, scalar_prefetch = 0 : i64, scratch_operands = 0 : i64, tpu.core_type = #tpu.core_type<tc>, window_params = [{transform_indices = @transform_0, window_bounds = array<i64: 1, 4, 16>}, {pipeline_mode = #tpu.pipeline_mode<synchronous>, transform_indices = @transform_1, window_bounds = array<i64: 4, 4>}, {pipeline_mode = #tpu.pipeline_mode<synchronous>, transform_indices = @transform_2, window_bounds = array<i64: 4, 4>}, {transform_indices = @transform_3, window_bounds = array<i64: 1, 4, 16>}]} {
    %c0 = arith.constant 0 : index
    %c0_0 = arith.constant 0 : index
    %c0_1 = arith.constant 0 : index
    %0 = vector.load %arg1[%c0, %c0_0, %c0_1] : memref<1x4x16xf32, #tpu.memory_space<vmem>>, vector<1x4x16xf32>
    %cst = arith.constant dense<0.000000e+00> : vector<1x4xf32>
    %1 = vector.multi_reduction <add>, %0, %cst [2] : vector<1x4x16xf32> to vector<1x4xf32>
    %cst_2 = arith.constant 6.250000e-02 : f32
    %2 = vector.broadcast %cst_2 : f32 to vector<1x4xf32>
    %3 = arith.mulf %1, %2 : vector<1x4xf32>
    %cst_3 = arith.constant dense<0xFF800000> : vector<1x4xf32>
    %4 = vector.multi_reduction <maximumf>, %0, %cst_3 [2] : vector<1x4x16xf32> to vector<1x4xf32>
    %c0_4 = arith.constant 0 : index
    %c0_5 = arith.constant 0 : index
    %5 = vector.load %arg2[%c0_4, %c0_5] : memref<4x4xf32, #tpu.memory_space<vmem>>, vector<4x4xf32>
    %c0_6 = arith.constant 0 : index
    %c0_7 = arith.constant 0 : index
    %6 = vector.load %arg3[%c0_6, %c0_7] : memref<4x4xf32, #tpu.memory_space<vmem>>, vector<4x4xf32>
    %cst_8 = arith.constant dense<0.000000e+00> : vector<1x4xf32>
    %7 = tpu.matmul %3, %5, %cst_8 {dimension_numbers = #tpu.dot_dimension_numbers<[1], [0], [0], [1], [0, 0, 1, 1], [], []>} : vector<1x4xf32>, vector<4x4xf32>, vector<1x4xf32> -> vector<1x4xf32>
    %cst_9 = arith.constant 0.000000e+00 : f32
    %8 = vector.broadcast %cst_9 : f32 to vector<1x4xf32>
    %9 = arith.maximumf %7, %8 : vector<1x4xf32>
    %cst_10 = arith.constant dense<0.000000e+00> : vector<1x4xf32>
    %10 = tpu.matmul %4, %5, %cst_10 {dimension_numbers = #tpu.dot_dimension_numbers<[1], [0], [0], [1], [0, 0, 1, 1], [], []>} : vector<1x4xf32>, vector<4x4xf32>, vector<1x4xf32> -> vector<1x4xf32>
    %cst_11 = arith.constant 0.000000e+00 : f32
    %11 = vector.broadcast %cst_11 : f32 to vector<1x4xf32>
    %12 = arith.maximumf %10, %11 : vector<1x4xf32>
    %13 = arith.addf %9, %12 : vector<1x4xf32>
    %cst_12 = arith.constant dense<0.000000e+00> : vector<1x4xf32>
    %14 = tpu.matmul %13, %6, %cst_12 {dimension_numbers = #tpu.dot_dimension_numbers<[1], [0], [0], [1], [0, 0, 1, 1], [], []>} : vector<1x4xf32>, vector<4x4xf32>, vector<1x4xf32> -> vector<1x4xf32>
    %cst_13 = arith.constant 0.000000e+00 : f32
    %15 = vector.broadcast %cst_13 : f32 to vector<1x4xf32>
    %16 = arith.subf %15, %14 : vector<1x4xf32>
    %17 = math.exp %16 : vector<1x4xf32>
    %cst_14 = arith.constant 1.000000e+00 : f32
    %18 = vector.broadcast %cst_14 : f32 to vector<1x4xf32>
    %19 = arith.addf %18, %17 : vector<1x4xf32>
    %cst_15 = arith.constant 1.000000e+00 : f32
    %20 = vector.broadcast %cst_15 : f32 to vector<1x4xf32>
    %21 = arith.divf %20, %19 : vector<1x4xf32>
    %22 = vector.shape_cast %21 : vector<1x4xf32> to vector<1x4x1xf32>
    %23 = vector.broadcast %22 : vector<1x4x1xf32> to vector<1x4x16xf32>
    %24 = arith.mulf %23, %0 : vector<1x4x16xf32>
    %c0_16 = arith.constant 0 : index
    %c0_17 = arith.constant 0 : index
    %c0_18 = arith.constant 0 : index
    %25 = vector.load %arg4[%c0_16, %c0_17, %c0_18] : memref<1x4x16xf32, #tpu.memory_space<vmem>>, vector<1x4x16xf32>
    tpu.vector_store %arg4[%c0_16, %c0_17, %c0_18], %24 {strides = array<i32>} : memref<1x4x16xf32, #tpu.memory_space<vmem>>, vector<1x4x16xf32>,
    return
  }
  func.func @transform_0(%arg0: i32) -> (i32, i32, i32) {
    %c0_i32 = arith.constant 0 : i32
    %c0_i32_0 = arith.constant 0 : i32
    %c0_i32_1 = arith.constant 0 : i32
    return %arg0, %c0_i32, %c0_i32_0 : i32, i32, i32
  }
  func.func @transform_1(%arg0: i32) -> (i32, i32) {
    %c0_i32 = arith.constant 0 : i32
    %c0_i32_0 = arith.constant 0 : i32
    %c0_i32_1 = arith.constant 0 : i32
    return %c0_i32, %c0_i32_0 : i32, i32
  }
  func.func @transform_2(%arg0: i32) -> (i32, i32) {
    %c0_i32 = arith.constant 0 : i32
    %c0_i32_0 = arith.constant 0 : i32
    %c0_i32_1 = arith.constant 0 : i32
    return %c0_i32, %c0_i32_0 : i32, i32
  }
  func.func @transform_3(%arg0: i32) -> (i32, i32, i32) {
    %c0_i32 = arith.constant 0 : i32
    %c0_i32_0 = arith.constant 0 : i32
    %c0_i32_1 = arith.constant 0 : i32
    return %arg0, %c0_i32, %c0_i32_0 : i32, i32, i32
  }
}

</mosaic_0001>

<bundles_post_ra>
// kernel: tpu_custom_call.1
= control target key start
LH: loop header
LB: loop body
LE: loop exit
PB: predicated region body
PF: predicated region fallthrough
CT: control target
= control target key end

     0   :  { %8 = vsyncpa [#allocation3], 0  ;;  %s1038_s0 = inlined_call_operand.hbm [shape: f32[2,4,16], index: 0, kind: input, shape index: {}]   ;;  %s1039_s1 = inlined_call_operand.hbm [shape: f32[4,4], index: 1, kind: input, shape index: {}]   ;;  %s1040_s2 = inlined_call_operand.vmem [shape: f32[4,4], index: 2, kind: input, shape index: {}]   ;;  %s1041_s3 = inlined_call_operand.hbm [shape: f32[2,4,16], index: 3, kind: output, shape index: {}]  }
   0x1   :  { %10 = vsyncpa [#allocation3 + $0x1], 0 }
   0x2   :  { %11 = vsyncpa [#allocation6], 0 }
   0x3   :  { %12 = vsyncpa [#allocation4], 0 }
   0x4   :  { %14 = vsyncpa [#allocation4 + $0x1], 0  ;;  %s818_s12 = smov 0   ;;  %s820_s13 = smov 0  }
   0x5   :  { %s822_s14 = smov 0   ;;  %s824_s15 = smov 0  }
   0x6 LB: > { %s839_s16 = sadd.s32 4294967295, %s791_s15   ;;  %s559_s17 = sadd.s32 4294967294, %s791_s15   ;;  %s791_s15 = sphi %s824_s15, %s1065_s15   ;;  %s787_s14 = sphi %s822_s14, %s1064_s14   ;;  %s783_s13 = sphi %s820_s13, %s1063_s13   ;;  %s779_s12 = sphi %s818_s12, %s1062_s12  }
   0x7   : > { %p40_p0 = scmp.ne.s32.totalorder %s783_s13, %s779_s12  ;;  %p1042_p1 = scmp.eq.s32.totalorder %s839_s16, 0 }
   0x8   : > { %p112_p3 = scmp.eq.s32.totalorder %s559_s17, 1  ;;  %p560_p5 = scmp.ge.s32.totalorder %s791_s15, 1 }
   0x9   : > { %p848_p4 = por %p1042_p1, %p40_p0  ;;  %p119_p7 = scmp.lt.s32.totalorder %s791_s15, 3 }
   0xa   : > { %p853_p6 = por %p112_p3, %p40_p0  ;;  %s793_s21 = smov [#allocation5]  }
   0xb   : > { %s1045_s18 = scalar_select %p848_p4, 1, 0 }
   0xc   : > { %s1046_s19 = scalar_select %p853_p6, 1, 0 }
   0xd   : > { %p858_p8 = pnand %p560_p5, %p119_p7  ;;  %s132_s22 = sshll.u32 %s793_s21, 4  ;;  %s133_s22 = int_to_ptr.vmem [resolvable:$true] %s132_s22 }
   0xe   : > { %s866_s23 = sadd.s32 1, %s791_s15   ;;  %s27_s27 = sadd.s32 1, %s787_s14 }
   0xf   : > { %s1047_s20 = scalar_select %p858_p8, 1, 0 }
  0x10   : > { %p608_p10 = pneg %p858_p8  ;;  %s24_s25 = ssub.s32 %s791_s15, %s866_s23 }
  0x11   : > { %p876_p12 = scmp.eq.s32.totalorder %s24_s25, 0  ;;  %s663_s30 = scalar_lea.hbm %s1039_s1, 64 }
  0x12   : > { %p870_p11 = pnand %p608_p10, %p1042_p1  ;;  %p664_p0 = scmp.ne.s32.totalorder %s1039_s1, %s663_s30 }
  0x13   : > { %s1049_s26 = scalar_select %p876_p12, 1, 0 }
  0x14   : > { %p665_p3 = pneg %p870_p11  ;;  %p670_p10 = scmp.lt.u32.totalorder %s663_s30, %s1039_s1 }
  0x16   : > { %p666_p5 = pnand %p665_p3, %p664_p0 }
  0x18   : > { %p667_p7 = pneg %p666_p5 }
  0x1a   : > { %p672_p9 = pnand %p670_p10, %p667_p7 }
  0x1c   : > { %675 = shalt.err (!%p672_p9)
}
  0x1d   : > { %s676_s8 = scalar_lea.vmem %s133_s22, 64  ;;  %p684_p6 = scmp.lt.s32.totalorder %s133_s22, %s133_s22 }
  0x1e   : > { %p677_p1 = scmp.ne.s32.totalorder %s133_s22, %s676_s8  ;;  %p685_p4 = scmp.lt.s32.totalorder %s676_s8, %s676_s8 }
  0x20   : > { %p679_p2 = pnand %p677_p1, %p665_p3  ;;  %p686_p8 = por %p685_p4, %p684_p6 }
  0x22   : > { %p680_p13 = pneg %p679_p2 }
  0x24   : > { %p687_p12 = pnand %p686_p8, %p680_p13 }
  0x26   : > { %690 = shalt.err (!%p687_p12)
}
  0x27   : > { %611 = dma.hbm_to_vmem [thread:$0]  (!%p870_p11), %s1039_s1, 64, %s133_s22, [#allocation6]  }
  0x28   : > { %p1050_p1 = scmp.ne.s32.totalorder %s1049_s26, 0  ;;  %p35_p2 = scmp.eq.s32.totalorder %s791_s15, 0 }
  0x29   : > { %p1051_p4 = scmp.ne.s32.totalorder %s787_s14, %s783_s13  ;;  %p1052_p6 = scmp.eq.s32.totalorder %s839_s16, 1 }
  0x2a   : > { %s902_s11 = scalar_select %p1050_p1, %s787_s14, %s27_s27  }
  0x2b   : > { %p910_p8 = por %p1052_p6, %p1051_p4  ;;  %p621_p9 = scmp.lt.s32.totalorder %s791_s15, 2 }
  0x2c   : > { %s146_s21 = sand.u32 1, %s787_s14   ;;  %p1054_p12 = pmov %p1051_p4 }
  0x2d   : > { %s563_s24 = sshll.u32 %s146_s21, 2  ;;  %s564_s25 = sshll.u32 %s791_s15, 6 }
  0x2e   : > { %p36_p13 = por %p35_p2, %p1054_p12  ;;  %s923_s22 = scalar_lea.hbm %s1038_s0, %s564_s25 }
  0x2f   : > { %s150_s26 = scalar_lea.vmem [#allocation2], %s563_s24  ;;  %s147_s4 = scalar_lea.sflag [#allocation3], %s146_s21 }
  0x30   : > { %s157_s27 = sshll.u32 %s150_s26, 4  ;;  %p925_p11 = pnand %p621_p9, %p36_p13  ;;  %s929_s27 = int_to_ptr.vmem [resolvable:$true] %s157_s27 }
  0x31   : > { %s691_s5 = scalar_lea.hbm %s923_s22, 64  ;;  %s696_s8 = scalar_lea.hbm %s1038_s0, 128 }
  0x32   : > { %p692_p0 = scmp.ne.s32.totalorder %s923_s22, %s691_s5  ;;  %p693_p3 = pneg %p925_p11 }
  0x33   : > { %p697_p10 = scmp.lt.u32.totalorder %s923_s22, %s1038_s0  ;;  %p698_p1 = scmp.lt.u32.totalorder %s696_s8, %s691_s5 }
  0x34   : > { %p694_p5 = pnand %p693_p3, %p692_p0  ;;  %p700_p4 = scmp.lt.u32.totalorder %s691_s5, %s923_s22 }
  0x35   : > { %p699_p2 = por %p698_p1, %p697_p10 }
  0x36   : > { %p695_p7 = pneg %p694_p5 }
  0x37   : > { %p701_p6 = por %p700_p4, %p699_p2 }
  0x39   : > { %p702_p9 = pnand %p701_p6, %p695_p7 }
  0x3b   : > { %705 = shalt.err (!%p702_p9)
}
  0x3c   : > { %s706_s21 = scalar_lea.vmem %s929_s27, 64  ;;  %s794_s24 = smov [#allocation2]  }
  0x3d   : > { %p707_p12 = scmp.ne.s32.totalorder %s929_s27, %s706_s21  ;;  %s711_s25 = sshll.u32 %s794_s24, 4  ;;  %s712_s25 = int_to_ptr.vmem [resolvable:$false] %s711_s25 }
  0x3e   : > { %s713_s28 = scalar_lea.vmem %s712_s25, 128  ;;  %p714_p5 = scmp.lt.s32.totalorder %s929_s27, %s712_s25 }
  0x3f   : > { %p709_p13 = pnand %p707_p12, %p693_p3  ;;  %p715_p10 = scmp.lt.s32.totalorder %s713_s28, %s706_s21 }
  0x41   : > { %p710_p0 = pneg %p709_p13  ;;  %p716_p1 = por %p715_p10, %p714_p5 }
  0x43   : > { %p717_p2 = pnand %p716_p1, %p710_p0 }
  0x45   : > { %720 = shalt.err (!%p717_p2)
}
  0x46   : > { %615 = dma.hbm_to_vmem [thread:$0]  (!%p925_p11), %s923_s22, 64, %s929_s27, %s147_s4  }
  0x47   : > { %p1056_p7 = scmp.ne.s32.totalorder %s1047_s20, 0 }
  0x48   : > { %s959_s29 = sand.u32 (!%p1056_p7), 1, %s783_s13   ;;  %p1057_p3 = scmp.ne.s32.totalorder (!%p1056_p7), %s1045_s18, 0 }
  0x49   : > { %166 = sbr.rel (%p1056_p7) target bundleno = 823 (0x337), region = 32  ;;  %s566_s26 = sshll.u32 (!%p1056_p7), %s959_s29, 2 }
  0x4a   : > { %s169_s5 = scalar_lea.sflag (!%p1056_p7), [#allocation3], %s959_s29  ;;  %s172_s6 = scalar_lea.vmem (!%p1056_p7), [#allocation2], %s566_s26 }
  0x50   : > { %766 = dma.done.wait (%p1057_p3), %s169_s5, 64  }
  0x51   : > { %768 = vsyncadd (%p1057_p3), %s169_s5, 4294967232  ;;  %p1058_p11 = scmp.eq.s32.totalorder %s839_s16, 0 }
  0x53   : > { %770 = dma.done.wait (%p1058_p11), [#allocation6], 64   ;;  %p1059_p4 = pmov %p1058_p11 }
  0x54   : > { %vm200_vm0 = vcmask 125952   ;;  %v199_v0 = vld [vmem:[%s172_s6] sm:$0xf]  ;;  %v795_v3 = vmov 0.0   ;;  %v208_v4 = vld [vmem:[#allocation5] sm:$0xf]  ;;  %v211_v5 = vlaneseq }
  0x55   : > { %772 = vsyncadd (%p1059_p4), [#allocation6], 4294967232  ;;  %v201_v1 = vsel %vm200_vm0, %v199_v0, 0.0  ;;  %v205_v2 = vsel %vm200_vm0, %v199_v0, -inf  ;;  %585 = vmatprep.subr.mxu0 %v795_v3  ;;  %vm220_vm1 = vcmask 1043456   ;;  %590 = vmatprep.subr.mxu1 %v795_v3  ;;  %vm796_vm2 = vmmov 0  }
  0x56   : > { %202 = vadd.xlane.f32.xlu0 %v201_v1  ;;  %586 = vmatpush3.msk.msra.mxu0 %vm220_vm1, %v208_v4  ;;  %v212_v6 = vand.u32 127, %v211_v5  ;;  %v214_v7 = vshrl.u32 %v211_v5, 7  ;;  %vm217_vm3 = vcmask 31744   ;;  %v209_v14 = vld [vmem:[%s1040_s2] sm:$0xf]  ;;  %s576_s22 = sshll.u32 %s839_s16, 6 }
  0x57   : > { %587 = vmatprep.mubr.msk.f32.mxu0 %vm796_vm2, %v795_v3  ;;  %591 = vmatpush3.msk.msra.mxu1 %vm220_vm1, %v208_v4  ;;  %s198_s27 = scalar_lea.vmem [#allocation7], %s566_s26  ;;  %s993_s8 = scalar_lea.hbm %s1041_s3, %s576_s22 }
  0x58   : > { %592 = vmatprep.mubr.msk.f32.mxu1 %vm796_vm2, %v795_v3  ;;  %595 = vmatprep.subr.mxu0 %v795_v3  ;;  %v215_v8 = vsub.s32 %v212_v6, %v214_v7  ;;  %v458_v28 = vsub.s32 0, %v214_v7  ;;  %s479_s30 = sshll.u32 %s198_s27, 4  ;;  %s466_s9 = scalar_lea.sflag [#allocation4], %s959_s29  ;;  %s995_s30 = int_to_ptr.vmem [resolvable:$true] %s479_s30 }
  0x59   : > { %s721_s10 = scalar_lea.vmem %s995_s30, 64  ;;  %s797_s16 = smov [#allocation7]  }
  0x5a   : > { %206 = vmax.xlane.f32.xlu0 %v205_v2  ;;  %p722_p6 = scmp.ne.s32.totalorder %s995_s30, %s721_s10  ;;  %s725_s21 = sshll.u32 %s797_s16, 4  ;;  %s726_s21 = int_to_ptr.vmem [resolvable:$false] %s725_s21 }
  0x5b   : > { %s727_s24 = scalar_lea.vmem %s726_s21, 128  ;;  %p728_p13 = scmp.lt.s32.totalorder %s995_s30, %s726_s21 }
  0x5c   : > { %p723_p9 = pnand %p722_p6, %p910_p8  ;;  %p729_p0 = scmp.lt.s32.totalorder %s727_s24, %s721_s10 }
  0x5e   : > { %p724_p12 = pneg %p723_p9  ;;  %p730_p5 = por %p729_p0, %p728_p13 }
  0x60   : > { %p731_p10 = pnand %p730_p5, %p724_p12 }
  0xe3   : > { %v203_v9 = vpop.xlane.xlu0 %202 }
  0xe4   : > { %v204_v10 = vmul.f32 0.0625, %v203_v9 }
  0xe6   : > { %v216_v11 = vrot.slane %v204_v10, %v215_v8 }
  0xe7   : > { %v207_v12 = vpop.xlane.xlu0 %206 }
  0xe8   : > { %v299_v13 = vrot.slane %v207_v12, %v215_v8  ;;  %588 = vmatmul.mubr.msk.f32.vlgmr.msra.gmra.mrb[0].mxu0 %vm217_vm3, %v216_v11 }
  0xe9   : > { %597 = vmatprep.mubr.msk.f32.mxu0 %vm796_vm2, %v795_v3  ;;  %596 = vmatpush3.msk.msra.mxu0 %vm220_vm1, %v209_v14 }
  0xea   : > { %593 = vmatmul.mubr.msk.f32.vlgmr.msra.gmra.mrb[0].mxu1 %vm217_vm3, %v299_v13 }
 0x1bb   : > { %v290_v15 = vpop.f32.mrb[0].mxu0 }
 0x1bc   : > { %v589_v16 = vpop.f32.mrb[1].mxu0  ;;  %v294_v18 = vmax.f32 %v290_v15, 0.0 }
 0x1bd   : > { %v368_v17 = vpop.f32.mrb[0].mxu1 }
 0x1be   : > { %v372_v19 = vmax.f32 %v368_v17, 0.0  ;;  %v594_v20 = vpop.f32.mrb[1].mxu1 }
 0x1c0   : > { %v373_v21 = vadd.f32 %v372_v19, %v294_v18 }
 0x1c2   : > { %598 = vmatmul.mubr.msk.f32.vlgmr.msra.gmra.mrb[2].mxu0 %vm217_vm3, %v373_v21 }
 0x295   : > { %v446_v22 = vpop.f32.mrb[2].mxu0 }
 0x296   : > { %v450_v23 = vsub.f32 0.0, %v446_v22  ;;  %v599_v24 = vpop.f32.mrb[3].mxu0 }
 0x298   : > { %v451_v25 = vmul.f32 1.442695, %v450_v23 }
 0x29a   : > { %659 = vpow2.f32 %v451_v25 }
 0x2a4   : > { %v660_v26 = vpop.eup %659 }
 0x2a5   : > { %v453_v27 = vadd.f32 1.0, %v660_v26 }
 0x2a7   : > { %661 = vrcp.f32 %v453_v27 }
 0x2b1   : > { %v662_v29 = vpop.eup %661 }
 0x2b2   : > { %v459_v30 = vrot.slane %v662_v29, %v458_v28 }
 0x2b4   : > { %461 = vbcast.lane.b32.xlu1 %v459_v30, 256 }
 0x326   : > { %v462_v31 = vpop.permute.xlu1 %461 }
 0x327   : > { %v463_v32 = vmul.f32 %v462_v31, %v199_v0 }
 0x329   : > { %464 = vst.msk [vmem:[%s198_s27] sm:$0xf] %vm200_vm0, %v463_v32 }
 0x32a   : > { %734 = shalt.err (!%p731_p10)
}
 0x32b   : > { %s735_s25 = scalar_lea.hbm %s993_s8, 64  ;;  %s739_s26 = scalar_lea.hbm %s1041_s3, 128 }
 0x32c   : > { %p736_p1 = scmp.ne.s32.totalorder %s993_s8, %s735_s25  ;;  %p740_p3 = scmp.lt.u32.totalorder %s993_s8, %s1041_s3 }
 0x32d   : > { %p741_p11 = scmp.lt.u32.totalorder %s739_s26, %s735_s25  ;;  %p743_p6 = scmp.lt.u32.totalorder %s735_s25, %s993_s8 }
 0x32e   : > { %p737_p2 = pnand %p736_p1, %p910_p8 }
 0x32f   : > { %p742_p4 = por %p741_p11, %p740_p3 }
 0x330   : > { %p738_p7 = pneg %p737_p2 }
 0x331   : > { %p744_p9 = por %p743_p6, %p742_p4 }
 0x333   : > { %p745_p12 = pnand %p744_p9, %p738_p7 }
 0x335   : > { %748 = shalt.err (!%p745_p12)
}
 0x336   : > { %606 = dma.vmem_to_hbm [thread:$0]  (%p910_p8), %s995_s30, 64, %s993_s8, %s466_s9  }
 0x337 PF: > { %s491_s18 = sand.u32 1, %s779_s12   ;;  %p1060_p13 = scmp.ne.s32.totalorder %s1046_s19, 0 }
 0x338   : > { %p1061_p0 = scmp.ge.s32.totalorder %s791_s15, 2  ;;  %s492_s20 = scalar_lea.sflag [#allocation4], %s491_s18 }
 0x33a   : > { %p617_p5 = pnand %p1061_p0, %p1060_p13 }
 0x33c   : > { %774 = dma.done.wait (!%p617_p5), %s492_s20, 64  }
 0x33d   : > { %776 = vsyncadd (!%p617_p5), %s492_s20, 4294967232  ;;  %p17_p10 = scmp.ge.s32.totalorder %s866_s23, 4   ;;  %s1062_s12 = smov %s783_s13 }
 0x33e   : > { %s1063_s13 = smov %s787_s14  ;;  %s1064_s14 = smov %s902_s11 }
 0x33f   : > { %s1065_s15 = smov %s866_s23  ;;  %19 = sbr.rel (!%p17_p10) target bundleno = 6 (0x6), region = 81 }
 0x346   :  { %497 = vsyncpa [#allocation3], 1 }
 0x347   :  { %499 = vsyncpa [#allocation3 + $0x1], 1 }
 0x348   :  { %500 = vsyncpa [#allocation6], 1 }
 0x349   :  { %501 = vsyncpa [#allocation4], 1 }
 0x34a   :  { %503 = vsyncpa [#allocation4 + $0x1], 1 }

</bundles_post_ra>
